<compile_context>
chip_gen: v6e
topology: v6e:2x2x1
jax: 0.10.0
libtpu: 0.0.40
codegen_flags: <defaults>
</compile_context>

<pallas_src>
import functools
import math

import jax
import jax.numpy as jnp
from jax import lax
from jax.experimental import pallas as pl
from jax.experimental.pallas import tpu as pltpu


# MXU operand dtype (accumulation is always f32 via preferred_element_type) and the dtype of
# inter-layer activations in HBM.  Set both to jnp.float32 for bit-exact parity checks.
_MXU_DTYPE = jnp.bfloat16
_INTERLAYER_DTYPE = jnp.bfloat16


def _round_up(x, m):
    return ((x + m - 1) // m) * m


def _vmem_params():
    """(per-block working-set budget, vmem_limit cap) per TPU generation."""
    try:
        kind = jax.devices()[0].device_kind.lower()
    except Exception:  # pragma: no cover - defensive (e.g. CPU interpret runs)
        kind = ""
    if "v7" in kind:
        return 20 * 1024 * 1024, 56 * 1024 * 1024      # v7x: 64 MiB physical VMEM
    return 64 * 1024 * 1024, 110 * 1024 * 1024         # v5e / v6e: 128 MiB physical VMEM


def _block_cost_model(sc, c_out, kg, h, in_bytes, out_bytes, w_bytes, w_buffers,
                      use_mxu, separate_res):
    """VMEM bytes per output-time row (per_row) and tile-independent bytes (fixed)."""
    per_row = 2 * sc * in_bytes             # input block, double-buffered
    per_row += 2 * c_out * out_bytes        # output block, double-buffered
    per_row += c_out * 4                    # f32 scratch accumulator
    per_row += 2 * c_out * 4                # activation / tap-result temporaries
    if use_mxu and in_bytes > 2:
        per_row += sc * 2                   # bf16 copy of the input MXU operand
    if separate_res:
        per_row += 2 * c_out * in_bytes     # residual block, double-buffered
    fixed = 2 * h * sc * in_bytes           # halo block, double-buffered
    fixed += w_buffers * kg * sc * c_out * w_bytes   # resident weights
    return per_row, fixed


def _pick_tile_t(t_out, per_row, fixed, h, budget):
    """Largest multiple-of-8 output-time tile whose modeled working set fits the budget."""
    tile = (budget - fixed) // max(per_row, 1)
    tile = max(8, min(int(tile), 1024))      # past ~1K rows the HBM roofline is saturated
    tile = (tile // 8) * 8
    tile = min(tile, _round_up(t_out, 8))    # tiny inputs -> single tile
    tile = max(tile, _round_up(h + 1, 8))    # tile must cover the halo
    return int(tile)


def _weight_blockspec(kg, sc, c_out, w_bytes):
    """Constant-index weight BlockSpec; single-buffered when the block is big enough to matter.

    Returns (spec, buffer_count) so the VMEM cost model stays consistent with what was requested.
    """
    idx = lambda t, b: (0, 0, 0)
    shape = (kg, sc, c_out)
    if kg * sc * c_out * w_bytes >= (1 << 20):   # only bother for multi-MiB weight blocks
        try:
            return pl.BlockSpec(shape, idx, pipeline_mode=pl.Buffered(1)), 1
        except Exception:  # pragma: no cover - older jax without pipeline_mode support
            pass
    return pl.BlockSpec(shape, idx), 2


def _activation(x, name):
    if name == "relu":
        return jnp.maximum(x, 0.0)
    if name == "gelu":
        # exact erf form, matching torch nn.GELU() default (not the tanh approximation)
        return 0.5 * x * (1.0 + lax.erf(x * (1.0 / math.sqrt(2.0))))
    if name == "leaky_relu":
        return jnp.where(x >= 0, x, 0.01 * x)
    raise ValueError("unknown activation " + name)


def _conv_block_kernel(x_ref, halo_ref, w_ref, *rest,
                       tile_t, kg, k, stride, c_in, c_out, act, use_mxu,
                       mxu_dtype, skip_mode, res_scale, log_epilogue):
    """One (time-tile, batch) block of a strided 1-D conv + activation (+skip) (+log).

    x_ref:    (1, tile_t, stride*C_in)  grouped input rows (group i == frames [i*s, (i+1)*s))
    halo_ref: (1, 1, H, stride*C_in)    first H groups of the *next* tile
    w_ref:    (Kg, stride*C_in, C_out)  taps folded into the contraction (zero-padded tail),
                                        pre-cast to the MXU / VPU dtype in the wrapper
    o_ref:    (1, tile_t, C_out)
    acc_ref:  (tile_t, C_out) f32       VMEM scratch accumulator
    """
    if skip_mode == "separate":
        res_ref, o_ref, acc_ref = rest
    else:
        o_ref, acc_ref = rest

    x_blk = x_ref[0]            # (tile_t, S*C_in)
    halo_blk = halo_ref[0, 0]   # (H, S*C_in)

    if use_mxu:
        x_mm = x_blk if x_blk.dtype == mxu_dtype else x_blk.astype(mxu_dtype)
        h_mm = halo_blk if halo_blk.dtype == mxu_dtype else halo_blk.astype(mxu_dtype)
        for g in range(kg):      # small static unroll (Kg is typically 2)
            w_g = w_ref[g]       # (S*C_in, C_out), already the MXU dtype
            if g == 0:
                acc_ref[...] = jnp.dot(x_mm, w_g, preferred_element_type=jnp.float32)
            else:
                # Main/tail contributions accumulate in place into disjoint row ranges of
                # the scratch accumulator -- no (tile_t, C_out) concatenate slabs.
                acc_ref[:tile_t - g, :] += jnp.dot(
                    x_mm[g:], w_g, preferred_element_type=jnp.float32)
                acc_ref[tile_t - g:, :] += jnp.dot(
                    h_mm[:g], w_g, preferred_element_type=jnp.float32)
    else:
        # Tiny contraction (first layer, C_in == 1): VPU broadcast FMAs in f32, MXU idle.
        # TODO(synk): lane-dense repacking (R output frames per row) would fill the 128 lanes.
        x_vp = x_blk.astype(jnp.float32)
        h_vp = halo_blk.astype(jnp.float32)
        first = True
        for p in range(k):
            g, s = divmod(p, stride)
            for c in range(c_in):
                col = s * c_in + c
                w_row = w_ref[g, col:col + 1, :]                  # (1, C_out), f32
                main = x_vp[g:, col:col + 1] * w_row              # (tile_t - g, C_out)
                if g == 0:
                    if first:
                        acc_ref[...] = main
                        first = False
                    else:
                        acc_ref[...] += main
                else:
                    acc_ref[:tile_t - g, :] += main
                    acc_ref[tile_t - g:, :] += h_vp[:g, col:col + 1] * w_row

    y = _activation(acc_ref[...], act)

    if skip_mode == "inkernel":
        # Skip source == this layer's own input subsampled every `stride` frames, which in the
        # grouped layout is channels [0:C_in) of each group row (no extra HBM stream).
        y = (y + x_blk[:, 0:c_in].astype(jnp.float32)) * res_scale
    elif skip_mode == "separate":
        y = (y + res_ref[0].astype(jnp.float32)) * res_scale

    if log_epilogue:
        y = jnp.log(jnp.abs(y) + 1.0)    # fused log-compression (VPU/EUP epilogue)

    o_ref[0] = y.astype(o_ref.dtype)


def conv1d_layer(x, w, stride, *, activation, skip=False, res_scale=1.0,
                 log_epilogue=False, out_dtype=None, mxu_dtype=_MXU_DTYPE):
    """Strided valid 1-D conv (no bias) + activation (+skip, +log) on channels-last input.

    x: (B, T_in, C_in);  w: (K, C_in, C_out) float32.
    Returns (B, T_out, C_out) with T_out = (T_in - K)//stride + 1, dtype `out_dtype`.
    """
    B, T_in, C_in = (int(d) for d in x.shape)
    K, _, C_out = (int(d) for d in w.shape)
    stride = int(stride)
    T_out = (T_in - K) // stride + 1
    if T_out < 1:
        raise ValueError("input too short for conv layer")
    out_dtype = x.dtype if out_dtype is None else out_dtype

    Kg = -(-K // stride)              # tap groups after folding stride into the contraction
    SC = stride * C_in                # contraction per tap group
    H = max(Kg - 1, 1)                # halo rows (groups) needed from the next tile

    skip = bool(skip) and (C_in == C_out)
    step = T_in // T_out              # torch residual subsample step
    skip_mode = "none"
    if skip:
        skip_mode = "inkernel" if step == stride else "separate"

    use_mxu = SC >= 16                # tiny contractions (first layer) go to the VPU path
    w_dtype = mxu_dtype if use_mxu else jnp.float32
    in_bytes = jnp.dtype(x.dtype).itemsize
    out_bytes = jnp.dtype(out_dtype).itemsize
    w_bytes = jnp.dtype(w_dtype).itemsize

    w_spec, w_buffers = _weight_blockspec(Kg, SC, C_out, w_bytes)

    per_row, fixed = _block_cost_model(SC, C_out, Kg, H, in_bytes, out_bytes, w_bytes,
                                       w_buffers, use_mxu, skip_mode == "separate")
    budget, vmem_cap = _vmem_params()
    tile_t = _pick_tile_t(T_out, per_row, fixed, H, budget)

    n_t = -(-T_out // tile_t)
    G_main = n_t * tile_t
    G_total = G_main + H
    F_total = G_total * stride

    # Zero-pad (or drop unused trailing frames) so the grouped view tiles exactly.
    if F_total >= T_in:
        xp = jnp.pad(x, ((0, 0), (0, F_total - T_in), (0, 0)))
    else:
        xp = x[:, :F_total, :]
    xg = xp.reshape(B, G_total, SC)           # contiguous, free reshape
    x_main = xg[:, :G_main, :]

    # Halo side array: tile t's halo = xg rows [(t+1)*tile_t, (t+1)*tile_t + H).  Built with a
    # bounded row gather (touches only n_t*H rows; never a second full pass over the input).
    halo_idx = ((jnp.arange(n_t) + 1) * tile_t)[:, None] + jnp.arange(H)[None, :]
    x_halo = jnp.take(xg, halo_idx.reshape(-1), axis=1).reshape(B, n_t, H, SC)

    # Fold taps + stride into the contraction and pre-cast to the MXU operand dtype in the
    # wrapper (half the resident weight VMEM, no per-tile cast in the kernel).
    w_fold = jnp.pad(w, ((0, Kg * stride - K), (0, 0), (0, 0)))
    w_fold = w_fold.reshape(Kg, SC, C_out).astype(w_dtype)

    kern = functools.partial(
        _conv_block_kernel, tile_t=tile_t, kg=Kg, k=K, stride=stride,
        c_in=C_in, c_out=C_out, act=activation, use_mxu=use_mxu,
        mxu_dtype=mxu_dtype, skip_mode=skip_mode, res_scale=float(res_scale),
        log_epilogue=bool(log_epilogue))

    in_specs = [
        pl.BlockSpec((1, tile_t, SC), lambda t, b: (b, t, 0)),
        pl.BlockSpec((1, 1, H, SC), lambda t, b: (b, t, 0, 0)),
        w_spec,                                        # constant index -> weights stay resident
    ]
    inputs = [x_main, x_halo, w_fold]

    if skip_mode == "separate":
        # Rare fallback (torch subsample step != stride): tiled residual input.
        res = x[:, ::step, :][:, :T_out, :]
        res = jnp.pad(res, ((0, 0), (0, G_main - T_out), (0, 0)))
        in_specs.append(pl.BlockSpec((1, tile_t, C_out), lambda t, b: (b, t, 0)))
        inputs.append(res)

    modeled = fixed + tile_t * per_row
    vmem_limit = int(min(vmem_cap, max(32 << 20, modeled + modeled // 3 + (6 << 20))))

    out = pl.pallas_call(
        kern,
        out_shape=jax.ShapeDtypeStruct((B, G_main, C_out), out_dtype),
        # Time leads the grid so the long axis is what gets split across TensorCores (v7x).
        grid=(n_t, B),
        in_specs=in_specs,
        out_specs=pl.BlockSpec((1, tile_t, C_out), lambda t, b: (b, t, 0)),
        scratch_shapes=[pltpu.VMEM((tile_t, C_out), jnp.float32)],
        compiler_params=pltpu.CompilerParams(
            dimension_semantics=("parallel", "parallel"),
            vmem_limit_bytes=vmem_limit),
    )(*inputs)

    return out[:, :T_out, :]


class RawConvFeatureExtraction:
    """JAX/Pallas re-implementation of the PyTorch RawConvFeatureExtraction forward."""

    def __init__(self, config, key):
        self.config = dict(config)
        self.config["residual_scale"] = math.sqrt(self.config["residual_scale"])
        self.activation = self.config["activation"]
        # Deterministic synthetic init (Conv1d-like uniform bound 1/sqrt(fan_in)).
        # TODO(synk): load_weights_from (torch checkpoint loading) has no in-script equivalent.
        self.layer_meta = []          # (k, stride)
        weights = []
        in_d = 1
        for (dim, k, stride) in self.config["conv_layers"]:
            key, sub = jax.random.split(key)
            fan_in = in_d * int(k)
            bound = 1.0 / math.sqrt(fan_in)
            w = jax.random.uniform(sub, (int(k), int(in_d), int(dim)),
                                   jnp.float32, -bound, bound)
            weights.append(w)
            self.layer_meta.append((int(k), int(stride)))
            in_d = int(dim)
        self.weights = tuple(weights)
        self._forward = jax.jit(self._forward_impl)

    def _forward_impl(self, x, weights):
        if x.ndim == 2:
            x = x[:, None, :]
        x = jnp.transpose(x, (0, 2, 1))          # torch NCW -> channels-last (B, T, C)
        n_layers = len(weights)
        for li, (w, (k, stride)) in enumerate(zip(weights, self.layer_meta)):
            c_in = int(x.shape[2])
            c_out = int(w.shape[2])
            do_skip = bool(self.config["skip_connections"]) and (c_out == c_in)
            last = li == n_layers - 1
            x = conv1d_layer(
                x, w, stride,
                activation=self.activation,
                skip=do_skip,
                res_scale=self.config["residual_scale"],
                log_epilogue=bool(self.config["log_compression"]) and last,
                out_dtype=jnp.float32 if last else _INTERLAYER_DTYPE)
        if n_layers == 0 and self.config["log_compression"]:
            x = jnp.log(jnp.abs(x) + 1.0)
        # TODO(synk): this trailing NCW transpose could be fused into the last layer's store
        # (block (1, C_out, tile_t) + in-kernel XLU transpose); kept out to stay on
        # conservatively-supported Mosaic lowering paths.
        return jnp.transpose(x, (0, 2, 1))       # back to torch NCW (B, C, T)

    def __call__(self, x, freeze=False):
        # TODO(synk): freeze/requires_grad, dropout (p>0) and spec_augment are training-only;
        #             the deterministic forward implemented here is unaffected by them.
        del freeze
        return self._forward(x, self.weights), None, None


def _reference_forward(x, weights, layer_meta, config, activation_name):
    """Pure-JAX f32 reference mirroring the torch forward (for a tolerance check)."""
    scale = math.sqrt(config["residual_scale"])
    h = x[:, None, :] if x.ndim == 2 else x
    for w, (k, stride) in zip(weights, layer_meta):
        resid = h
        w_oih = jnp.transpose(w, (2, 1, 0))      # (K, C_in, C_out) -> (C_out, C_in, K)
        h = lax.conv_general_dilated(h, w_oih, window_strides=(stride,), padding="VALID",
                                     dimension_numbers=("NCH", "OIH", "NCH"))
        h = _activation(h, activation_name)
        if config["skip_connections"] and h.shape[1] == resid.shape[1]:
            tsz, r_tsz = h.shape[2], resid.shape[2]
            resid = resid[..., ::r_tsz // tsz][..., :tsz]
            h = (h + resid) * scale
    if config["log_compression"]:
        h = jnp.log(jnp.abs(h) + 1.0)
    return h


if __name__ == "__main__":
    config = {
        "conv_layers": [(32, 3, 2), (32, 3, 2)],
        "activation": "relu",
        "dropout": 0.0,
        "log_compression": True,
        "skip_connections": True,
        "residual_scale": 0.5,
    }
    key = jax.random.PRNGKey(0)
    kx, kw = jax.random.split(key)
    model = RawConvFeatureExtraction(config, kw)

    x = jax.random.normal(kx, (2, 64), jnp.float32)  # (B, T) raw waveform
    out, _, _ = model(x)
    jax.block_until_ready(out)
    assert out.shape == (2, 32, 15), out.shape
    assert bool(jnp.all(jnp.isfinite(out)))

    ref = _reference_forward(x, model.weights, model.layer_meta, config, config["activation"])
    max_err = float(jnp.max(jnp.abs(out.astype(jnp.float32) - ref)))
    assert max_err < 5e-2, f"max abs err vs reference = {max_err}"
    print("KERNEL_OK")
</pallas_src>

<mosaic_0001>
module attributes {stable_mosaic.version = 11 : i64} {
  func.func @_conv_block_kernel(%arg0: i32, %arg1: i32, %arg2: memref<1x16x64xbf16, #tpu.memory_space<vmem>>, %arg3: memref<1x1x1x64xbf16, #tpu.memory_space<vmem>>, %arg4: memref<2x64x32xbf16, #tpu.memory_space<vmem>>, %arg5: memref<1x16x32xf32, #tpu.memory_space<vmem>>, %arg6: memref<16x32xf32, #tpu.memory_space<vmem>>) attributes {dimension_semantics = [#tpu.dimension_semantics<parallel>, #tpu.dimension_semantics<parallel>], iteration_bounds = array<i64: 1, 2>, scalar_prefetch = 0 : i64, scratch_operands = 1 : i64, tpu.core_type = #tpu.core_type<tc>, window_params = [{transform_indices = @transform_0, window_bounds = array<i64: 1, 16, 64>}, {transform_indices = @transform_1, window_bounds = array<i64: 1, 1, 1, 64>}, {pipeline_mode = #tpu.pipeline_mode<synchronous>, transform_indices = @transform_2, window_bounds = array<i64: 2, 64, 32>}, {transform_indices = @transform_3, window_bounds = array<i64: 1, 16, 32>}]} {
    %c0 = arith.constant 0 : index
    %c0_0 = arith.constant 0 : index
    %c0_1 = arith.constant 0 : index
    %0 = vector.load %arg2[%c0, %c0_0, %c0_1] : memref<1x16x64xbf16, #tpu.memory_space<vmem>>, vector<1x16x64xbf16>
    %1 = vector.shape_cast %0 : vector<1x16x64xbf16> to vector<16x64xbf16>
    %c0_2 = arith.constant 0 : index
    %c0_3 = arith.constant 0 : index
    %c0_4 = arith.constant 0 : index
    %c0_5 = arith.constant 0 : index
    %2 = vector.load %arg3[%c0_2, %c0_3, %c0_4, %c0_5] : memref<1x1x1x64xbf16, #tpu.memory_space<vmem>>, vector<1x1x1x64xbf16>
    %3 = vector.shape_cast %2 : vector<1x1x1x64xbf16> to vector<1x64xbf16>
    %c0_6 = arith.constant 0 : index
    %c0_7 = arith.constant 0 : index
    %c0_8 = arith.constant 0 : index
    %4 = vector.load %arg4[%c0_6, %c0_7, %c0_8] : memref<2x64x32xbf16, #tpu.memory_space<vmem>>, vector<1x64x32xbf16>
    %5 = vector.shape_cast %4 : vector<1x64x32xbf16> to vector<64x32xbf16>
    %cst = arith.constant dense<0.000000e+00> : vector<16x32xf32>
    %6 = tpu.matmul %1, %5, %cst {dimension_numbers = #tpu.dot_dimension_numbers<[1], [0], [0], [1], [0, 0, 1, 1], [], []>} : vector<16x64xbf16>, vector<64x32xbf16>, vector<16x32xf32> -> vector<16x32xf32>
    %c0_9 = arith.constant 0 : index
    %c0_10 = arith.constant 0 : index
    %7 = vector.load %arg6[%c0_9, %c0_10] : memref<16x32xf32, #tpu.memory_space<vmem>>, vector<16x32xf32>
    tpu.vector_store %arg6[%c0_9, %c0_10], %6 {strides = array<i32>} : memref<16x32xf32, #tpu.memory_space<vmem>>, vector<16x32xf32>,
    %c1 = arith.constant 1 : index
    %c0_11 = arith.constant 0 : index
    %c0_12 = arith.constant 0 : index
    %8 = vector.load %arg4[%c1, %c0_11, %c0_12] : memref<2x64x32xbf16, #tpu.memory_space<vmem>>, vector<1x64x32xbf16>
    %9 = vector.shape_cast %8 : vector<1x64x32xbf16> to vector<64x32xbf16>
    %c0_13 = arith.constant 0 : index
    %c0_14 = arith.constant 0 : index
    %10 = vector.load %arg6[%c0_13, %c0_14] : memref<16x32xf32, #tpu.memory_space<vmem>>, vector<15x32xf32>
    %11 = vector.extract_strided_slice %1 {offsets = [1, 0], sizes = [15, 64], strides = [1, 1]} : vector<16x64xbf16> to vector<15x64xbf16>
    %cst_15 = arith.constant dense<0.000000e+00> : vector<15x32xf32>
    %12 = tpu.matmul %11, %9, %cst_15 {dimension_numbers = #tpu.dot_dimension_numbers<[1], [0], [0], [1], [0, 0, 1, 1], [], []>} : vector<15x64xbf16>, vector<64x32xbf16>, vector<15x32xf32> -> vector<15x32xf32>
    %13 = arith.addf %10, %12 : vector<15x32xf32>
    %c0_16 = arith.constant 0 : index
    %c0_17 = arith.constant 0 : index
    %14 = vector.load %arg6[%c0_16, %c0_17] : memref<16x32xf32, #tpu.memory_space<vmem>>, vector<15x32xf32>
    tpu.vector_store %arg6[%c0_16, %c0_17], %13 {strides = array<i32>} : memref<16x32xf32, #tpu.memory_space<vmem>>, vector<15x32xf32>,
    %c15 = arith.constant 15 : index
    %c0_18 = arith.constant 0 : index
    %15 = vector.load %arg6[%c15, %c0_18] : memref<16x32xf32, #tpu.memory_space<vmem>>, vector<1x32xf32>
    %cst_19 = arith.constant dense<0.000000e+00> : vector<1x32xf32>
    %16 = tpu.matmul %3, %9, %cst_19 {dimension_numbers = #tpu.dot_dimension_numbers<[1], [0], [0], [1], [0, 0, 1, 1], [], []>} : vector<1x64xbf16>, vector<64x32xbf16>, vector<1x32xf32> -> vector<1x32xf32>
    %17 = arith.addf %15, %16 : vector<1x32xf32>
    %c15_20 = arith.constant 15 : index
    %c0_21 = arith.constant 0 : index
    %18 = vector.load %arg6[%c15_20, %c0_21] : memref<16x32xf32, #tpu.memory_space<vmem>>, vector<1x32xf32>
    tpu.vector_store %arg6[%c15_20, %c0_21], %17 {strides = array<i32>} : memref<16x32xf32, #tpu.memory_space<vmem>>, vector<1x32xf32>,
    %c0_22 = arith.constant 0 : index
    %c0_23 = arith.constant 0 : index
    %19 = vector.load %arg6[%c0_22, %c0_23] : memref<16x32xf32, #tpu.memory_space<vmem>>, vector<16x32xf32>
    %cst_24 = arith.constant 0.000000e+00 : f32
    %20 = vector.broadcast %cst_24 : f32 to vector<16x32xf32>
    %21 = arith.maximumf %19, %20 : vector<16x32xf32>
    %22 = vector.extract_strided_slice %1 {offsets = [0, 0], sizes = [16, 32], strides = [1, 1]} : vector<16x64xbf16> to vector<16x32xbf16>
    %23 = arith.extf %22 : vector<16x32xbf16> to vector<16x32xf32>
    %24 = arith.addf %21, %23 : vector<16x32xf32>
    %cst_25 = arith.constant 0.707106769 : f32
    %25 = vector.broadcast %cst_25 : f32 to vector<16x32xf32>
    %26 = arith.mulf %24, %25 : vector<16x32xf32>
    %27 = math.absf %26 : vector<16x32xf32>
    %cst_26 = arith.constant 1.000000e+00 : f32
    %28 = vector.broadcast %cst_26 : f32 to vector<16x32xf32>
    %29 = arith.addf %27, %28 : vector<16x32xf32>
    %30 = math.log %29 : vector<16x32xf32>
    %c0_27 = arith.constant 0 : index
    %c0_28 = arith.constant 0 : index
    %c0_29 = arith.constant 0 : index
    %31 = vector.load %arg5[%c0_27, %c0_28, %c0_29] : memref<1x16x32xf32, #tpu.memory_space<vmem>>, vector<1x16x32xf32>
    %32 = vector.shape_cast %31 : vector<1x16x32xf32> to vector<16x32xf32>
    %33 = vector.shape_cast %30 : vector<16x32xf32> to vector<1x16x32xf32>
    tpu.vector_store %arg5[%c0_27, %c0_28, %c0_29], %33 {strides = array<i32>} : memref<1x16x32xf32, #tpu.memory_space<vmem>>, vector<1x16x32xf32>,
    return
  }
  func.func @transform_0(%arg0: i32, %arg1: i32) -> (i32, i32, i32) {
    %c0_i32 = arith.constant 0 : i32
    %c0_i32_0 = arith.constant 0 : i32
    return %arg1, %arg0, %c0_i32 : i32, i32, i32
  }
  func.func @transform_1(%arg0: i32, %arg1: i32) -> (i32, i32, i32, i32) {
    %c0_i32 = arith.constant 0 : i32
    %c0_i32_0 = arith.constant 0 : i32
    %c0_i32_1 = arith.constant 0 : i32
    return %arg1, %arg0, %c0_i32, %c0_i32_0 : i32, i32, i32, i32
  }
  func.func @transform_2(%arg0: i32, %arg1: i32) -> (i32, i32, i32) {
    %c0_i32 = arith.constant 0 : i32
    %c0_i32_0 = arith.constant 0 : i32
    %c0_i32_1 = arith.constant 0 : i32
    %c0_i32_2 = arith.constant 0 : i32
    return %c0_i32, %c0_i32_0, %c0_i32_1 : i32, i32, i32
  }
  func.func @transform_3(%arg0: i32, %arg1: i32) -> (i32, i32, i32) {
    %c0_i32 = arith.constant 0 : i32
    %c0_i32_0 = arith.constant 0 : i32
    return %arg1, %arg0, %c0_i32 : i32, i32, i32
  }
}

module attributes {stable_mosaic.version = 11 : i64} {
  func.func @_conv_block_kernel(%arg0: i32, %arg1: i32, %arg2: memref<1x32x2xf32, #tpu.memory_space<vmem>>, %arg3: memref<1x1x1x2xf32, #tpu.memory_space<vmem>>, %arg4: memref<2x2x32xf32, #tpu.memory_space<vmem>>, %arg5: memref<1x32x32xbf16, #tpu.memory_space<vmem>>, %arg6: memref<32x32xf32, #tpu.memory_space<vmem>>) attributes {dimension_semantics = [#tpu.dimension_semantics<parallel>, #tpu.dimension_semantics<parallel>], iteration_bounds = array<i64: 1, 2>, scalar_prefetch = 0 : i64, scratch_operands = 1 : i64, tpu.core_type = #tpu.core_type<tc>, window_params = [{transform_indices = @transform_0, window_bounds = array<i64: 1, 32, 2>}, {transform_indices = @transform_1, window_bounds = array<i64: 1, 1, 1, 2>}, {pipeline_mode = #tpu.pipeline_mode<synchronous>, transform_indices = @transform_2, window_bounds = array<i64: 2, 2, 32>}, {transform_indices = @transform_3, window_bounds = array<i64: 1, 32, 32>}]} {
    %c0 = arith.constant 0 : index
    %c0_0 = arith.constant 0 : index
    %c0_1 = arith.constant 0 : index
    %0 = vector.load %arg2[%c0, %c0_0, %c0_1] : memref<1x32x2xf32, #tpu.memory_space<vmem>>, vector<1x32x2xf32>
    %1 = vector.shape_cast %0 : vector<1x32x2xf32> to vector<32x2xf32>
    %c0_2 = arith.constant 0 : index
    %c0_3 = arith.constant 0 : index
    %c0_4 = arith.constant 0 : index
    %c0_5 = arith.constant 0 : index
    %2 = vector.load %arg3[%c0_2, %c0_3, %c0_4, %c0_5] : memref<1x1x1x2xf32, #tpu.memory_space<vmem>>, vector<1x1x1x2xf32>
    %3 = vector.shape_cast %2 : vector<1x1x1x2xf32> to vector<1x2xf32>
    %c0_6 = arith.constant 0 : index
    %c0_7 = arith.constant 0 : index
    %c0_8 = arith.constant 0 : index
    %4 = vector.load %arg4[%c0_6, %c0_7, %c0_8] : memref<2x2x32xf32, #tpu.memory_space<vmem>>, vector<1x1x32xf32>
    %5 = vector.shape_cast %4 : vector<1x1x32xf32> to vector<1x32xf32>
    %6 = vector.extract_strided_slice %1 {offsets = [0, 0], sizes = [32, 1], strides = [1, 1]} : vector<32x2xf32> to vector<32x1xf32>
    %7 = vector.broadcast %6 : vector<32x1xf32> to vector<32x32xf32>
    %8 = vector.broadcast %5 : vector<1x32xf32> to vector<32x32xf32>
    %9 = arith.mulf %7, %8 : vector<32x32xf32>
    %c0_9 = arith.constant 0 : index
    %c0_10 = arith.constant 0 : index
    %10 = vector.load %arg6[%c0_9, %c0_10] : memref<32x32xf32, #tpu.memory_space<vmem>>, vector<32x32xf32>
    tpu.vector_store %arg6[%c0_9, %c0_10], %9 {strides = array<i32>} : memref<32x32xf32, #tpu.memory_space<vmem>>, vector<32x32xf32>,
    %c0_11 = arith.constant 0 : index
    %c1 = arith.constant 1 : index
    %c0_12 = arith.constant 0 : index
    %11 = vector.load %arg4[%c0_11, %c1, %c0_12] : memref<2x2x32xf32, #tpu.memory_space<vmem>>, vector<1x1x32xf32>
    %12 = vector.shape_cast %11 : vector<1x1x32xf32> to vector<1x32xf32>
    %13 = vector.extract_strided_slice %1 {offsets = [0, 1], sizes = [32, 1], strides = [1, 1]} : vector<32x2xf32> to vector<32x1xf32>
    %14 = vector.broadcast %13 : vector<32x1xf32> to vector<32x32xf32>
    %15 = vector.broadcast %12 : vector<1x32xf32> to vector<32x32xf32>
    %16 = arith.mulf %14, %15 : vector<32x32xf32>
    %c0_13 = arith.constant 0 : index
    %c0_14 = arith.constant 0 : index
    %17 = vector.load %arg6[%c0_13, %c0_14] : memref<32x32xf32, #tpu.memory_space<vmem>>, vector<32x32xf32>
    %18 = arith.addf %17, %16 : vector<32x32xf32>
    %c0_15 = arith.constant 0 : index
    %c0_16 = arith.constant 0 : index
    %19 = vector.load %arg6[%c0_15, %c0_16] : memref<32x32xf32, #tpu.memory_space<vmem>>, vector<32x32xf32>
    tpu.vector_store %arg6[%c0_15, %c0_16], %18 {strides = array<i32>} : memref<32x32xf32, #tpu.memory_space<vmem>>, vector<32x32xf32>,
    %c1_17 = arith.constant 1 : index
    %c0_18 = arith.constant 0 : index
    %c0_19 = arith.constant 0 : index
    %20 = vector.load %arg4[%c1_17, %c0_18, %c0_19] : memref<2x2x32xf32, #tpu.memory_space<vmem>>, vector<1x1x32xf32>
    %21 = vector.shape_cast %20 : vector<1x1x32xf32> to vector<1x32xf32>
    %22 = vector.extract_strided_slice %1 {offsets = [1, 0], sizes = [31, 1], strides = [1, 1]} : vector<32x2xf32> to vector<31x1xf32>
    %23 = vector.broadcast %22 : vector<31x1xf32> to vector<31x32xf32>
    %24 = vector.broadcast %21 : vector<1x32xf32> to vector<31x32xf32>
    %25 = arith.mulf %23, %24 : vector<31x32xf32>
    %c0_20 = arith.constant 0 : index
    %c0_21 = arith.constant 0 : index
    %26 = vector.load %arg6[%c0_20, %c0_21] : memref<32x32xf32, #tpu.memory_space<vmem>>, vector<31x32xf32>
    %27 = arith.addf %26, %25 : vector<31x32xf32>
    %c0_22 = arith.constant 0 : index
    %c0_23 = arith.constant 0 : index
    %28 = vector.load %arg6[%c0_22, %c0_23] : memref<32x32xf32, #tpu.memory_space<vmem>>, vector<31x32xf32>
    tpu.vector_store %arg6[%c0_22, %c0_23], %27 {strides = array<i32>} : memref<32x32xf32, #tpu.memory_space<vmem>>, vector<31x32xf32>,
    %c31 = arith.constant 31 : index
    %c0_24 = arith.constant 0 : index
    %29 = vector.load %arg6[%c31, %c0_24] : memref<32x32xf32, #tpu.memory_space<vmem>>, vector<1x32xf32>
    %30 = vector.extract_strided_slice %3 {offsets = [0, 0], sizes = [1, 1], strides = [1, 1]} : vector<1x2xf32> to vector<1x1xf32>
    %31 = vector.broadcast %30 : vector<1x1xf32> to vector<1x32xf32>
    %32 = arith.mulf %31, %21 : vector<1x32xf32>
    %33 = arith.addf %29, %32 : vector<1x32xf32>
    %c31_25 = arith.constant 31 : index
    %c0_26 = arith.constant 0 : index
    %34 = vector.load %arg6[%c31_25, %c0_26] : memref<32x32xf32, #tpu.memory_space<vmem>>, vector<1x32xf32>
    tpu.vector_store %arg6[%c31_25, %c0_26], %33 {strides = array<i32>} : memref<32x32xf32, #tpu.memory_space<vmem>>, vector<1x32xf32>,
    %c0_27 = arith.constant 0 : index
    %c0_28 = arith.constant 0 : index
    %35 = vector.load %arg6[%c0_27, %c0_28] : memref<32x32xf32, #tpu.memory_space<vmem>>, vector<32x32xf32>
    %cst = arith.constant 0.000000e+00 : f32
    %36 = vector.broadcast %cst : f32 to vector<32x32xf32>
    %37 = arith.maximumf %35, %36 : vector<32x32xf32>
    %38 = arith.truncf %37 : vector<32x32xf32> to vector<32x32xbf16>
    %c0_29 = arith.constant 0 : index
    %c0_30 = arith.constant 0 : index
    %c0_31 = arith.constant 0 : index
    %39 = vector.load %arg5[%c0_29, %c0_30, %c0_31] : memref<1x32x32xbf16, #tpu.memory_space<vmem>>, vector<1x32x32xbf16>
    %40 = vector.shape_cast %39 : vector<1x32x32xbf16> to vector<32x32xbf16>
    %41 = vector.shape_cast %38 : vector<32x32xbf16> to vector<1x32x32xbf16>
    tpu.vector_store %arg5[%c0_29, %c0_30, %c0_31], %41 {strides = array<i32>} : memref<1x32x32xbf16, #tpu.memory_space<vmem>>, vector<1x32x32xbf16>,
    return
  }
  func.func @transform_0(%arg0: i32, %arg1: i32) -> (i32, i32, i32) {
    %c0_i32 = arith.constant 0 : i32
    %c0_i32_0 = arith.constant 0 : i32
    return %arg1, %arg0, %c0_i32 : i32, i32, i32
  }
  func.func @transform_1(%arg0: i32, %arg1: i32) -> (i32, i32, i32, i32) {
    %c0_i32 = arith.constant 0 : i32
    %c0_i32_0 = arith.constant 0 : i32
    %c0_i32_1 = arith.constant 0 : i32
    return %arg1, %arg0, %c0_i32, %c0_i32_0 : i32, i32, i32, i32
  }
  func.func @transform_2(%arg0: i32, %arg1: i32) -> (i32, i32, i32) {
    %c0_i32 = arith.constant 0 : i32
    %c0_i32_0 = arith.constant 0 : i32
    %c0_i32_1 = arith.constant 0 : i32
    %c0_i32_2 = arith.constant 0 : i32
    return %c0_i32, %c0_i32_0, %c0_i32_1 : i32, i32, i32
  }
  func.func @transform_3(%arg0: i32, %arg1: i32) -> (i32, i32, i32) {
    %c0_i32 = arith.constant 0 : i32
    %c0_i32_0 = arith.constant 0 : i32
    return %arg1, %arg0, %c0_i32 : i32, i32, i32
  }
}

</mosaic_0001>

<bundles_post_ra>
// kernel: _forward_impl.2
= control target key start
LH: loop header
LB: loop body
LE: loop exit
PB: predicated region body
PF: predicated region fallthrough
CT: control target
= control target key end

     0   :  { %s594_s12 = smov 0   ;;  %s596_s13 = smov 0   ;;  %s658_s0 = inlined_call_operand.vmem [shape: f32[2,32,2], index: 0, kind: input, shape index: {}]   ;;  %s659_s1 = inlined_call_operand.vmem [shape: f32[2,1,1,2], index: 1, kind: input, shape index: {}]   ;;  %s660_s2 = inlined_call_operand.vmem [shape: f32[2,2,32], index: 2, kind: input, shape index: {}]   ;;  %s661_s3 = inlined_call_operand.vmem [shape: bf16[2,32,32], index: 3, kind: output, shape index: {}]  }
   0x1   :  { %s598_s14 = smov 0  }
   0x2 LB: > { %s22_s15 = sadd.s32 1, %s566_s13  ;;  %p496_p0 = scmp.ge.s32.totalorder %s570_s14, 1  ;;  %s570_s14 = sphi %s598_s14, %s13_s14   ;;  %s566_s13 = sphi %s596_s13, %s663_s13   ;;  %s562_s12 = sphi %s594_s12, %s662_s12  }
   0x3   : > { %p23_p1 = scmp.ge.s32.totalorder %s22_s15, 2  ;;  %p171_p2 = scmp.lt.s32.totalorder %s570_s14, 3 }
   0x5   : > { %s665_s15 = smov (%p23_p1, %s22_s15), 0  ;;  %p172_p3 = pnand %p496_p0, %p171_p2 }
   0x6   : > { %p210_p4 = scmp.lt.s32.totalorder (!%p172_p3), %s562_s12, 1 }
   0x7   : > { %175 = sbr.rel (%p172_p3) target bundleno = 182 (0xb6), region = 32 }
   0xc   : > { %v572_v0 = vmov 0   ;;  %s667_s12 = smov (!%p210_p4, %s562_s12), 1  ;;  %v573_v5 = vmov 1   ;;  %v501_v7 = vld [vmem:[%s660_s2] ss:$0 sm:$0xff]  ;;  %v313_v8 = vlaneseq  ;;  %vm269_vm0 = vcmask 261120  }
   0xd   : > { %543 = vset.pattern.permute.xlu1 %v572_v0  ;;  %542 = vset.pattern.permute.xlu0 %v572_v0  ;;  %s510_s16 = sshll.u32 %s667_s12, 5  ;;  %s224_s22 = scalar_lea.vmem %s659_s1, %s667_s12  ;;  %v502_v19 = vld [vmem:[%s660_s2 + $0x1] ss:$0 sm:$0xff]  ;;  %v503_v20 = vld [vmem:[%s660_s2 + $0x2] sm:$0x1]  ;;  %vm329_vm1 = vcmask 1046528  }
   0xe   : > { %s217_s19 = scalar_lea.vmem %s658_s0, %s510_s16  ;;  %v239_v6 = vld [vmem:[%s224_s22] sm:$0x1]  ;;  %v314_v13 = vshrl.u32 %v313_v8, 7  ;;  %vm348_vm2 = vcmask 260096   ;;  %vm362_vm3 = vcmask 253952   ;;  %s511_s29 = sshll.u32 %s667_s12, 4 }
   0xf   : > { %v237_v1 = vld [vmem:[%s217_s19 + $0x10] sm:$0xff]  ;;  %v235_v2 = vld [vmem:[%s217_s19] sm:$0xff]  ;;  %v238_v3 = vld [vmem:[%s217_s19 + $0x18] sm:$0xff]  ;;  %s233_s5 = scalar_lea.vmem %s661_s3, %s511_s29  ;;  %vm388_vm4 = vcmask 257024  }
  0x10   : > { %253 = vperm.xlu1 %543, %v237_v1   ;;  %243 = vperm.xlu0 %542, %v235_v2   ;;  %v236_v4 = vld [vmem:[%s217_s19 + $0x8] sm:$0xff]  ;;  %v315_v18 = vsub.s32 0, %v314_v13 }
  0x12   : > { %v316_v25 = vrot.slane %v503_v20, %v315_v18 }
  0x14   : > { %258 = vperm.xlu1 %543, %v238_v3   ;;  %248 = vperm.xlu0 %542, %v236_v4  }
  0x18   : > { %545 = vset.pattern.permute.xlu1 %v573_v5  ;;  %544 = vset.pattern.permute.xlu0 %v573_v5 }
  0x19   : > { %280 = vperm.xlu1 %545, %v236_v4   ;;  %276 = vperm.xlu0 %544, %v235_v2  }
  0x1d   : > { %284 = vperm.xlu1 %545, %v237_v1   ;;  %288 = vperm.xlu0 %544, %v238_v3  }
  0x21   : > { %546 = vset.pattern.permute.xlu1 %v572_v0  ;;  %547 = vset.pattern.permute.xlu0 %v572_v0 }
  0x22   : > { %353 = vperm.xlu1 %546, %v239_v6  }
  0x8b   : > { %v254_v9 = vpop.permute.xlu1 %253  ;;  %v244_v10 = vpop.permute.xlu0 %243 }
  0x8c   : > { %v267_v11 = vmul.f32 %v501_v7, %v254_v9  ;;  %v265_v12 = vmul.f32 %v501_v7, %v244_v10  ;;  %v317_v35 = vmul.f32 %v316_v25, %v244_v10  ;;  %v319_v42 = vmul.f32 %v316_v25, %v254_v9 }
  0x8e   : > { %272 = vst.msk [vmem:[#allocation2 + $0x10] sm:$0xff] %vm269_vm0, %v267_v11  ;;  %270 = vst.msk [vmem:[#allocation2] sm:$0xff] %vm269_vm0, %v265_v12  ;;  %v330_v44 = vrot.slane %v317_v35, 1  ;;  %v333_v49 = vrot.slane %v319_v42, 1 }
  0x8f   : > { %v259_v14 = vpop.permute.xlu1 %258  ;;  %v249_v15 = vpop.permute.xlu0 %248 }
  0x90   : > { %v268_v16 = vmul.f32 %v501_v7, %v259_v14  ;;  %v266_v17 = vmul.f32 %v501_v7, %v249_v15  ;;  %v318_v27 = vmul.f32 %v316_v25, %v249_v15  ;;  %v320_v40 = vmul.f32 %v316_v25, %v259_v14 }
  0x92   : > { %273 = vst.msk [vmem:[#allocation2 + $0x18] sm:$0xff] %vm269_vm0, %v268_v16  ;;  %271 = vst.msk [vmem:[#allocation2 + $0x8] sm:$0xff] %vm269_vm0, %v266_v17  ;;  %v331_v41 = vrot.slane %v318_v27, 1  ;;  %v335_v46 = vrot.slane %v320_v40, 1 }
  0x94   : > { %v281_v21 = vpop.permute.xlu1 %280  ;;  %v277_v22 = vpop.permute.xlu0 %276  ;;  %v332_v47 = vsel %vm329_vm1, %v330_v44, %v331_v41  ;;  %v334_v52 = vsel %vm329_vm1, %v331_v41, %v333_v49  ;;  %v336_v54 = vsel %vm329_vm1, %v333_v49, %v335_v46 }
  0x95   : > { %v299_v23 = vld [vmem:[#allocation2] sm:$0xff]  ;;  %v295_v24 = vmul.f32 %v502_v19, %v277_v22  ;;  %v296_v28 = vmul.f32 %v502_v19, %v281_v21  ;;  %v301_v37 = vld [vmem:[#allocation2 + $0x10] sm:$0xff] }
  0x97   : > { %v303_v26 = vadd.f32 %v299_v23, %v295_v24 }
  0x98   : > { %v285_v29 = vpop.permute.xlu1 %284  ;;  %v289_v30 = vpop.permute.xlu0 %288 }
  0x99   : > { %v300_v31 = vld [vmem:[#allocation2 + $0x8] sm:$0xff]  ;;  %307 = vst.msk [vmem:[#allocation2] sm:$0xff] %vm269_vm0, %v303_v26  ;;  %v297_v32 = vmul.f32 %v502_v19, %v285_v29  ;;  %v302_v33 = vld [vmem:[#allocation2 + $0x18] sm:$0xff]  ;;  %v298_v34 = vmul.f32 %v502_v19, %v289_v30 }
  0x9a   : > { %v304_v36 = vadd.f32 %v300_v31, %v296_v28 }
  0x9b   : > { %v305_v38 = vadd.f32 %v301_v37, %v297_v32  ;;  %v306_v39 = vadd.f32 %v302_v33, %v298_v34 }
  0x9c   : > { %308 = vst.msk [vmem:[#allocation2 + $0x8] sm:$0xff] %vm269_vm0, %v304_v36 }
  0x9d   : > { %309 = vst.msk [vmem:[#allocation2 + $0x10] sm:$0xff] %vm269_vm0, %v305_v38  ;;  %310 = vst.msk [vmem:[#allocation2 + $0x18] sm:$0xff] %vm269_vm0, %v306_v39  ;;  %v354_v43 = vpop.permute.xlu1 %353 }
  0x9e   : > { %v359_v45 = vrot.slane %v354_v43, %v315_v18 }
  0xa0   : > { %v321_v48 = vld [vmem:[#allocation2] sm:$0xff]  ;;  %v360_v51 = vmul.f32 %v503_v20, %v359_v45 }
  0xa1   : > { %v341_v50 = vadd.f32 %v332_v47, %v321_v48 }
  0xa3   : > { %v322_v53 = vld [vmem:[#allocation2 + $0x8] sm:$0xff]  ;;  %345 = vst.msk [vmem:[#allocation2] sm:$0xff] %vm269_vm0, %v341_v50 }
  0xa4   : > { %v342_v55 = vadd.f32 %v334_v52, %v322_v53  ;;  %v323_v56 = vld [vmem:[#allocation2 + $0x10] sm:$0xff]  ;;  %v324_v57 = vld [vmem:[#allocation2 + $0x18] sm:$0x7f]  ;;  %v350_v58 = vld [vmem:[#allocation2 + $0x1f] sm:$0x1] }
  0xa5   : > { %v343_v59 = vadd.f32 %v336_v54, %v323_v56  ;;  %v344_v60 = vadd.f32 %v335_v46, %v324_v57  ;;  %v361_v61 = vadd.f32 %v360_v51, %v350_v58 }
  0xa6   : > { %346 = vst.msk [vmem:[#allocation2 + $0x8] sm:$0xff] %vm269_vm0, %v342_v55 }
  0xa7   : > { %347 = vst.msk [vmem:[#allocation2 + $0x10] sm:$0xff] %vm269_vm0, %v343_v59 }
  0xa8   : > { %349 = vst.msk [vmem:[#allocation2 + $0x18] sm:$0x7f] %vm348_vm2, %v344_v60 }
  0xa9   : > { %363 = vst.msk [vmem:[#allocation2 + $0x1f] sm:$0x1] %vm362_vm3, %v361_v61 }
  0xaa   : > { %v364_v62 = vld [vmem:[#allocation2] sm:$0xff] }
  0xab   : > { %v368_v63 = vmax.f32 %v364_v62, 0.0 }
  0xad   : > { %v365_v0 = vld [vmem:[#allocation2 + $0x8] sm:$0xff]  ;;  %v512_v1 = vpack.c.bf16 %v368_v63, %v368_v63 }
  0xae   : > { %v369_v2 = vmax.f32 %v365_v0, 0.0  ;;  %v366_v3 = vld [vmem:[#allocation2 + $0x10] sm:$0xff] }
  0xaf   : > { %389 = vst.msk [vmem:[%s233_s5] sm:$0xf] %vm388_vm4, %v512_v1  ;;  %v370_v5 = vmax.f32 %v366_v3, 0.0 }
  0xb0   : > { %v367_v4 = vld [vmem:[#allocation2 + $0x18] sm:$0xff]  ;;  %v513_v7 = vpack.c.bf16 %v369_v2, %v369_v2 }
  0xb1   : > { %v371_v6 = vmax.f32 %v367_v4, 0.0  ;;  %v514_v8 = vpack.c.bf16 %v370_v5, %v370_v5 }
  0xb2   : > { %390 = vst.msk [vmem:[%s233_s5 + $0x4] sm:$0xf] %vm388_vm4, %v513_v7 }
  0xb3   : > { %v515_v9 = vpack.c.bf16 %v371_v6, %v371_v6  ;;  %391 = vst.msk [vmem:[%s233_s5 + $0x8] sm:$0xf] %vm388_vm4, %v514_v8 }
  0xb5   : > { %392 = vst.msk [vmem:[%s233_s5 + $0xc] sm:$0xf] %vm388_vm4, %v515_v9 }
  0xb6 PF: > { %s13_s14 = sadd.s32 1, %s570_s14   ;;  %s662_s12 = smov %s566_s13 }
  0xb7   : > { %p10_p5 = scmp.ge.s32.totalorder %s13_s14, 4   ;;  %s663_s13 = smov %s665_s15 }
  0xb9   :  { %12 = sbr.rel (!%p10_p5) target bundleno = 2 (0x2), region = 66 }

// kernel: _forward_impl.3
= control target key start
LH: loop header
LB: loop body
LE: loop exit
PB: predicated region body
PF: predicated region fallthrough
CT: control target
= control target key end

     0   :  { %s750_s12 = smov 0   ;;  %s752_s13 = smov 0   ;;  %s833_s0 = inlined_call_operand.vmem [shape: bf16[2,16,64], index: 0, kind: input, shape index: {}]   ;;  %s834_s1 = inlined_call_operand.vmem [shape: bf16[2,1,1,64], index: 1, kind: input, shape index: {}]   ;;  %s835_s2 = inlined_call_operand.vmem [shape: bf16[2,64,32], index: 2, kind: input, shape index: {}]   ;;  %s836_s3 = inlined_call_operand.vmem [shape: f32[2,16,32], index: 3, kind: output, shape index: {}]  }
   0x1   :  { %s754_s14 = smov 0  }
   0x2 LB: > { %s22_s15 = sadd.s32 1, %s722_s13  ;;  %p584_p0 = scmp.ge.s32.totalorder %s726_s14, 1  ;;  %s726_s14 = sphi %s754_s14, %s13_s14   ;;  %s722_s13 = sphi %s752_s13, %s838_s13   ;;  %s718_s12 = sphi %s750_s12, %s837_s12  }
   0x3   : > { %p23_p1 = scmp.ge.s32.totalorder %s22_s15, 2  ;;  %p171_p2 = scmp.lt.s32.totalorder %s726_s14, 3 }
   0x5   : > { %s840_s15 = smov (%p23_p1, %s22_s15), 0  ;;  %p172_p3 = pnand %p584_p0, %p171_p2 }
   0x6   : > { %p210_p4 = scmp.lt.s32.totalorder (!%p172_p3), %s718_s12, 1 }
   0x7   : > { %175 = sbr.rel (%p172_p3) target bundleno = 275 (0x113), region = 32 }
   0xc   : > { %v690_v0 = vld [vmem:[%s835_s2 + $0x18] sm:$0xff]   ;;  %v728_v1 = vmov 0.0   ;;  %v691_v2 = vld [vmem:[%s835_s2 + $0x10] sm:$0xff]   ;;  %vm729_vm0 = vmmov 0   ;;  %s842_s12 = smov (!%p210_p4, %s718_s12), 1  ;;  %v693_v5 = vld [vmem:[%s835_s2 + $0x8] sm:$0xff]  }
   0xd   : > { %628 = vmatprep.subr.bf16.mxu0 %v728_v1  ;;  %640 = vmatprep.subr.bf16.mxu1 %v728_v1  ;;  %v692_v3 = vld [vmem:[%s835_s2 + $0x38] sm:$0xff]   ;;  %v694_v4 = vld [vmem:[%s835_s2 + $0x30] sm:$0xff]   ;;  %s611_s26 = sshll.u32 %s842_s12, 3  ;;  %v696_v6 = vld [vmem:[%s835_s2 + $0x28] sm:$0xff]   ;;  %vm276_vm1 = vcmask 523264   ;;  %s224_s11 = scalar_lea.vmem %s834_s1, %s842_s12  ;;  %vm321_vm2 = vcmask 261120  }
   0xe   : > { %629 = vmatpush3.bf16.msra.mxu0 %v690_v0  ;;  %636 = vmatprep.mubr.msk.bf16.mxu0 %vm729_vm0, %v728_v1  ;;  %s217_s29 = scalar_lea.vmem %s833_s0, %s611_s26  ;;  %v695_v8 = vld [vmem:[%s835_s2] sm:$0xff]   ;;  %vm412_vm3 = vcmask 260096   ;;  %vm459_vm4 = vcmask 253952   ;;  %s612_s16 = sshll.u32 %s842_s12, 4 }
   0xf   : > { %630 = vmatprep.subr.bf16.mxu0 %v728_v1  ;;  %648 = vmatprep.mubr.msk.bf16.mxu1 %vm729_vm0, %v728_v1  ;;  %v794_v7 = vld [vmem:[%s217_s29] sm:$0xff]   ;;  %s233_s19 = scalar_lea.vmem %s836_s3, %s612_s16 }
  0x10   : > { %641 = vmatpush3.bf16.msra.mxu1 %v692_v3  ;;  %v335_v9 = vshrl.u32 %v794_v7, 16  ;;  %v337_v10 = vshll.u32 %v794_v7, 16  ;;  %v698_v11 = vld [vmem:[%s835_s2 + $0x20] sm:$0xff]   ;;  %v465_v29 = vunpack.c.l.bf16 %v794_v7  ;;  %v466_v38 = vunpack.c.h.bf16 %v794_v7 }
  0x11   : > { %642 = vmatprep.subr.bf16.mxu1 %v728_v1  ;;  %v238_v14 = vld [vmem:[%s224_s11] sm:$0x1] }
  0x12   : > { %631 = vmatpush3.bf16.msra.mxu0 %v691_v2  ;;  %v339_v12 = vrot.slane %v337_v10, 1 }
  0x13   : > { %632 = vmatprep.subr.bf16.mxu0 %v728_v1 }
  0x14   : > { %643 = vmatpush3.bf16.msra.mxu1 %v694_v4  ;;  %v340_v13 = vor.u32 %v339_v12, %v335_v9 }
  0x15   : > { %644 = vmatprep.subr.bf16.mxu1 %v728_v1 }
  0x16   : > { %633 = vmatpush3.bf16.msra.mxu0 %v693_v5 }
  0x17   : > { %634 = vmatprep.subr.bf16.mxu0 %v728_v1 }
  0x18   : > { %645 = vmatpush3.bf16.msra.mxu1 %v696_v6 }
  0x19   : > { %646 = vmatprep.subr.bf16.mxu1 %v728_v1 }
  0x1a   : > { %635 = vmatpush3.bf16.msra.mxu0 %v695_v8 }
  0x1b   : > { %652 = vmatprep.subr.bf16.mxu0 %v728_v1 }
  0x1c   : > { %647 = vmatpush3.bf16.msra.mxu1 %v698_v11 }
  0x1d   : > { %637 = vmatmul.mubr.msk.bf16.vlgmr.msra.gmra.mxu0 %vm276_vm1, %v794_v7 }
  0x1e   : > { %653 = vmatpush3.bf16.msra.mxu0 %v692_v3  ;;  %660 = vmatprep.mubr.msk.bf16.mxu0 %vm729_vm0, %v728_v1 }
  0x1f   : > { %654 = vmatprep.subr.bf16.mxu0 %v728_v1  ;;  %649 = vmatmul.mubr.msk.bf16.vlgmr.msra.gmra.mxu1 %vm276_vm1, %v340_v13 }
  0x22   : > { %655 = vmatpush3.bf16.msra.mxu0 %v694_v4 }
  0x23   : > { %656 = vmatprep.subr.bf16.mxu0 %v728_v1 }
  0x26   : > { %657 = vmatpush3.bf16.msra.mxu0 %v696_v6 }
  0x27   : > { %658 = vmatprep.subr.bf16.mxu0 %v728_v1 }
  0x2a   : > { %659 = vmatpush3.bf16.msra.mxu0 %v698_v11 }
  0x2d   : > { %661 = vmatmul.mubr.msk.bf16.vlgmr.msra.gmra.mxu0 %vm276_vm1, %v238_v14 }
  0xdd   : > { %v314_v15 = vpop.f32.mrf.mxu0 }
  0xde   : > { %322 = vst.msk [vmem:[#allocation2] sm:$0xff] %vm321_vm2, %v314_v15 }
  0xdf   : > { %v638_v16 = vpop.f32.mrf.mxu0  ;;  %v402_v17 = vpop.f32.mrf.mxu1 }
  0xe1   : > { %v317_v18 = vpop.f32.mrf.mxu0  ;;  %v650_v19 = vpop.f32.mrf.mxu1 }
  0xe2   : > { %323 = vst.msk [vmem:[#allocation2 + $0x8] sm:$0xff] %vm321_vm2, %v317_v18 }
  0xe3   : > { %v639_v20 = vpop.f32.mrf.mxu0  ;;  %v405_v21 = vpop.f32.mrf.mxu1 }
  0xe5   : > { %v333_v22 = vld [vmem:[#allocation2] sm:$0xff]  ;;  %v651_v23 = vpop.f32.mrf.mxu1 }
  0xe6   : > { %v409_v24 = vadd.f32 %v402_v17, %v333_v22 }
  0xe8   : > { %411 = vst.msk [vmem:[#allocation2] sm:$0xff] %vm321_vm2, %v409_v24 }
  0xe9   : > { %v334_v25 = vld [vmem:[#allocation2 + $0x8] sm:$0x7f]  ;;  %v414_v27 = vld [vmem:[#allocation2 + $0xf] sm:$0x1] }
  0xea   : > { %v410_v26 = vadd.f32 %v405_v21, %v334_v25 }
  0xec   : > { %413 = vst.msk [vmem:[#allocation2 + $0x8] sm:$0x7f] %vm412_vm3, %v410_v26 }
  0xed   : > { %v452_v28 = vpop.f32.mrf.mxu0 }
  0xee   : > { %v458_v30 = vadd.f32 %v452_v28, %v414_v27 }
  0xef   : > { %v461_v31 = vld [vmem:[#allocation2] sm:$0xff]  ;;  %v662_v32 = vpop.f32.mrf.mxu0 }
  0xf0   : > { %v463_v33 = vmax.f32 %v461_v31, 0.0  ;;  %460 = vst.msk [vmem:[#allocation2 + $0xf] sm:$0x1] %vm459_vm4, %v458_v30 }
  0xf1   : > { %v455_v34 = vpop.f32.mrf.mxu0 }
  0xf2   : > { %v467_v35 = vadd.f32 %v465_v29, %v463_v33 }
  0xf3   : > { %v663_v36 = vpop.f32.mrf.mxu0 }
  0xf4   : > { %v469_v37 = vmul.f32 0.70710677, %v467_v35 }
  0xf6   : > { %v471_v39 = vand.u32 2147483647, %v469_v37 }
  0xf7   : > { %v462_v40 = vld [vmem:[#allocation2 + $0x8] sm:$0xff] }
  0xf8   : > { %v473_v41 = vadd.f32 1.0, %v471_v39  ;;  %v464_v42 = vmax.f32 %v462_v40, 0.0 }
  0xfa   : > { %700 = vlog2.f32 %v473_v41  ;;  %v468_v43 = vadd.f32 %v466_v38, %v464_v42 }
  0xfc   : > { %v470_v44 = vmul.f32 0.70710677, %v468_v43 }
  0xfe   : > { %v472_v45 = vand.u32 2147483647, %v470_v44 }
 0x100   : > { %v474_v46 = vadd.f32 1.0, %v472_v45 }
 0x102   : > { %702 = vlog2.f32 %v474_v46 }
 0x107   : > { %v701_v47 = vpop.eup %700 }
 0x108   : > { %v476_v48 = vmul.f32 0.6931472, %v701_v47 }
 0x10a   : > { %479 = vst.msk [vmem:[%s233_s19] sm:$0xff] %vm321_vm2, %v476_v48 }
 0x10f   : > { %v703_v49 = vpop.eup %702 }
 0x110   : > { %v478_v50 = vmul.f32 0.6931472, %v703_v49 }
 0x112   : > { %480 = vst.msk [vmem:[%s233_s19 + $0x8] sm:$0xff] %vm321_vm2, %v478_v50 }
 0x113 PF: > { %s13_s14 = sadd.s32 1, %s726_s14   ;;  %s837_s12 = smov %s722_s13 }
 0x114   : > { %p10_p5 = scmp.ge.s32.totalorder %s13_s14, 4   ;;  %s838_s13 = smov %s840_s15 }
 0x116   :  { %12 = sbr.rel (!%p10_p5) target bundleno = 2 (0x2), region = 66 }

</bundles_post_ra>
